<compile_context>
chip_gen: v5e
topology: v5e:2x2
jax: 0.10.0
libtpu: 0.0.40
codegen_flags: <defaults>
</compile_context>

<pallas_src>
import jax
import jax.numpy as jnp
from jax.experimental import pallas as pl
from jax.experimental.pallas import tpu as pltpu

EPS = 1e-5


def _projection_kernel(a_ref, doc_ref, w1_ref, w2_ref, bn1_ref, bn2_ref,
                       oa_ref, odoc_ref):
    B = a_ref.shape[0]
    # x[N, K] . w[M, K] -> [N, M]  (weights stay in PyTorch [out, in] layout)
    dnums = (((1,), (1,)), ((), ()))

    # Both branches stacked on the sublane/batch axis -> one MXU push per layer.
    x = jnp.concatenate([a_ref[...], doc_ref[...]], axis=0)           # [2B, D]

    # ---- Linear(D, D). Bias omitted: cancelled by the following training-mode BN.
    h = jax.lax.dot_general(x, w1_ref[...], dnums,
                            preferred_element_type=jnp.float32)       # [2B, D]

    # ---- BatchNorm1d(D) with per-branch batch statistics, then ReLU.
    hb = h.reshape(2, B, h.shape[-1])                                  # [2, B, D]
    mean1 = jnp.mean(hb, axis=1, keepdims=True)                        # [2, 1, D]
    var1 = jnp.mean(jnp.square(hb - mean1), axis=1, keepdims=True)     # [2, 1, D]
    scale1 = bn1_ref[0:1, :] * jax.lax.rsqrt(var1 + EPS)               # gamma folded
    hb = (hb - mean1) * scale1 + bn1_ref[1:2, :]
    hb = jnp.maximum(hb, 0.0)

    # ---- Linear(D, E). Bias omitted (same cancellation).
    h2 = hb.reshape(2 * B, hb.shape[-1])                               # [2B, D]
    y = jax.lax.dot_general(h2, w2_ref[...], dnums,
                            preferred_element_type=jnp.float32)        # [2B, E]

    # ---- BatchNorm1d(E) with per-branch batch statistics.
    yb = y.reshape(2, B, y.shape[-1])                                  # [2, B, E]
    mean2 = jnp.mean(yb, axis=1, keepdims=True)
    var2 = jnp.mean(jnp.square(yb - mean2), axis=1, keepdims=True)
    scale2 = bn2_ref[0:1, :] * jax.lax.rsqrt(var2 + EPS)
    yb = (yb - mean2) * scale2 + bn2_ref[1:2, :]

    oa_ref[...] = yb[0].astype(oa_ref.dtype)
    odoc_ref[...] = yb[1].astype(odoc_ref.dtype)


def add_projection_forward(a, doc, params):
    """Pallas implementation of AddProjection.forward(a, doc)."""
    w1, b1, g1, be1, w2, b2, g2, be2 = params
    del b1, b2  # cancelled by training-mode BatchNorm; the kernel never reads them
    B, D = a.shape
    E = w2.shape[0]
    assert doc.shape == (B, D) and w1.shape == (D, D) and w2.shape == (E, D)

    # Pack the tiny per-feature vectors: row 0 = gamma, row 1 = beta.
    bn1 = jnp.stack([g1, be1], axis=0)                                 # [2, D]
    bn2 = jnp.stack([g2, be2], axis=0)                                 # [2, E]

    vmem = pl.BlockSpec(memory_space=pltpu.MemorySpace.VMEM)
    out_a, out_doc = pl.pallas_call(
        _projection_kernel,
        out_shape=(jax.ShapeDtypeStruct((B, E), jnp.float32),
                   jax.ShapeDtypeStruct((B, E), jnp.float32)),
        in_specs=[vmem] * 6,
        out_specs=(vmem, vmem),
    )(a, doc, w1, w2, bn1, bn2)
    return out_a, out_doc


def init_params(key, mlp_dim, embedding_size):
    """PyTorch-like defaults (Linear: U(-1/sqrt(in), 1/sqrt(in)); BN: gamma=1, beta=0)."""
    k1, k2, k3, k4 = jax.random.split(key, 4)
    bound = 1.0 / (mlp_dim ** 0.5)
    w1 = jax.random.uniform(k1, (mlp_dim, mlp_dim), jnp.float32, -bound, bound)
    b1 = jax.random.uniform(k2, (mlp_dim,), jnp.float32, -bound, bound)
    g1 = jnp.ones((mlp_dim,), jnp.float32)
    be1 = jnp.zeros((mlp_dim,), jnp.float32)
    w2 = jax.random.uniform(k3, (embedding_size, mlp_dim), jnp.float32, -bound, bound)
    b2 = jax.random.uniform(k4, (embedding_size,), jnp.float32, -bound, bound)
    g2 = jnp.ones((embedding_size,), jnp.float32)
    be2 = jnp.zeros((embedding_size,), jnp.float32)
    return (w1, b1, g1, be1, w2, b2, g2, be2)


def _reference(x, params):
    """Pure-JAX reference of the PyTorch module (training-mode BatchNorm1d),
    INCLUDING the Linear biases — verifies they are indeed cancelled by BN."""
    w1, b1, g1, be1, w2, b2, g2, be2 = params
    h = x @ w1.T + b1
    m = h.mean(0, keepdims=True)
    v = ((h - m) ** 2).mean(0, keepdims=True)
    h = (h - m) / jnp.sqrt(v + EPS) * g1 + be1
    h = jnp.maximum(h, 0.0)
    y = h @ w2.T + b2
    m2 = y.mean(0, keepdims=True)
    v2 = ((y - m2) ** 2).mean(0, keepdims=True)
    return (y - m2) / jnp.sqrt(v2 + EPS) * g2 + be2


if __name__ == "__main__":
    B = 8            # batch
    MLP_DIM = 32     # sentence embedding dimension
    EMB = 16         # projection embedding_size

    key = jax.random.PRNGKey(0)
    ka, kd, kp = jax.random.split(key, 3)
    a = jax.random.normal(ka, (B, MLP_DIM), jnp.float32)
    doc = jax.random.normal(kd, (B, MLP_DIM), jnp.float32)
    params = init_params(kp, MLP_DIM, EMB)

    out_a, out_doc = add_projection_forward(a, doc, params)
    out_a = jax.block_until_ready(out_a)
    out_doc = jax.block_until_ready(out_doc)

    ref_a = _reference(a, params)
    ref_doc = _reference(doc, params)
    assert out_a.shape == (B, EMB) and out_doc.shape == (B, EMB)
    assert jnp.allclose(out_a, ref_a, atol=1e-4, rtol=1e-4)
    assert jnp.allclose(out_doc, ref_doc, atol=1e-4, rtol=1e-4)

    print("KERNEL_OK")
</pallas_src>

<mosaic_0001>
module attributes {stable_mosaic.version = 11 : i64} {
  func.func @_projection_kernel(%arg0: memref<8x32xf32, #tpu.memory_space<vmem>>, %arg1: memref<8x32xf32, #tpu.memory_space<vmem>>, %arg2: memref<32x32xf32, #tpu.memory_space<vmem>>, %arg3: memref<16x32xf32, #tpu.memory_space<vmem>>, %arg4: memref<2x32xf32, #tpu.memory_space<vmem>>, %arg5: memref<2x16xf32, #tpu.memory_space<vmem>>, %arg6: memref<8x16xf32, #tpu.memory_space<vmem>>, %arg7: memref<8x16xf32, #tpu.memory_space<vmem>>) attributes {dimension_semantics = [], scalar_prefetch = 0 : i64, scratch_operands = 0 : i64, tpu.core_type = #tpu.core_type<tc>} {
    %c0 = arith.constant 0 : index
    %c0_0 = arith.constant 0 : index
    %0 = vector.load %arg0[%c0, %c0_0] : memref<8x32xf32, #tpu.memory_space<vmem>>, vector<8x32xf32>
    %c0_1 = arith.constant 0 : index
    %c0_2 = arith.constant 0 : index
    %1 = vector.load %arg1[%c0_1, %c0_2] : memref<8x32xf32, #tpu.memory_space<vmem>>, vector<8x32xf32>
    %2 = tpu.concatenate %0, %1 in 0 : vector<8x32xf32>, vector<8x32xf32> -> vector<16x32xf32>
    %c0_3 = arith.constant 0 : index
    %c0_4 = arith.constant 0 : index
    %3 = vector.load %arg2[%c0_3, %c0_4] : memref<32x32xf32, #tpu.memory_space<vmem>>, vector<32x32xf32>
    %cst = arith.constant dense<0.000000e+00> : vector<16x32xf32>
    %4 = tpu.matmul %2, %3, %cst {dimension_numbers = #tpu.dot_dimension_numbers<[1], [1], [0], [0], [0, 0, 1, 0], [], []>} : vector<16x32xf32>, vector<32x32xf32>, vector<16x32xf32> -> vector<16x32xf32>
    %5 = vector.shape_cast %4 : vector<16x32xf32> to vector<2x8x32xf32>
    %cst_5 = arith.constant dense<0.000000e+00> : vector<2x32xf32>
    %6 = vector.multi_reduction <add>, %5, %cst_5 [1] : vector<2x8x32xf32> to vector<2x32xf32>
    %7 = vector.shape_cast %6 : vector<2x32xf32> to vector<2x1x32xf32>
    %cst_6 = arith.constant 8.000000e+00 : f32
    %8 = vector.broadcast %cst_6 : f32 to vector<2x1x32xf32>
    %9 = arith.divf %7, %8 : vector<2x1x32xf32>
    %10 = vector.broadcast %9 : vector<2x1x32xf32> to vector<2x8x32xf32>
    %11 = arith.subf %5, %10 : vector<2x8x32xf32>
    %12 = arith.mulf %11, %11 : vector<2x8x32xf32>
    %cst_7 = arith.constant dense<0.000000e+00> : vector<2x32xf32>
    %13 = vector.multi_reduction <add>, %12, %cst_7 [1] : vector<2x8x32xf32> to vector<2x32xf32>
    %14 = vector.shape_cast %13 : vector<2x32xf32> to vector<2x1x32xf32>
    %cst_8 = arith.constant 8.000000e+00 : f32
    %15 = vector.broadcast %cst_8 : f32 to vector<2x1x32xf32>
    %16 = arith.divf %14, %15 : vector<2x1x32xf32>
    %c0_9 = arith.constant 0 : index
    %c0_10 = arith.constant 0 : index
    %17 = vector.load %arg4[%c0_9, %c0_10] : memref<2x32xf32, #tpu.memory_space<vmem>>, vector<1x32xf32>
    %cst_11 = arith.constant 9.99999974E-6 : f32
    %18 = vector.broadcast %cst_11 : f32 to vector<2x1x32xf32>
    %19 = arith.addf %16, %18 : vector<2x1x32xf32>
    %20 = math.rsqrt %19 : vector<2x1x32xf32>
    %21 = vector.shape_cast %17 : vector<1x32xf32> to vector<1x1x32xf32>
    %22 = vector.broadcast %21 : vector<1x1x32xf32> to vector<2x1x32xf32>
    %23 = arith.mulf %22, %20 : vector<2x1x32xf32>
    %24 = vector.broadcast %9 : vector<2x1x32xf32> to vector<2x8x32xf32>
    %25 = arith.subf %5, %24 : vector<2x8x32xf32>
    %26 = vector.broadcast %23 : vector<2x1x32xf32> to vector<2x8x32xf32>
    %27 = arith.mulf %25, %26 : vector<2x8x32xf32>
    %c1 = arith.constant 1 : index
    %c0_12 = arith.constant 0 : index
    %28 = vector.load %arg4[%c1, %c0_12] : memref<2x32xf32, #tpu.memory_space<vmem>>, vector<1x32xf32>
    %29 = vector.shape_cast %28 : vector<1x32xf32> to vector<1x1x32xf32>
    %30 = vector.broadcast %29 : vector<1x1x32xf32> to vector<2x8x32xf32>
    %31 = arith.addf %27, %30 : vector<2x8x32xf32>
    %cst_13 = arith.constant 0.000000e+00 : f32
    %32 = vector.broadcast %cst_13 : f32 to vector<2x8x32xf32>
    %33 = arith.maximumf %31, %32 : vector<2x8x32xf32>
    %34 = vector.shape_cast %33 : vector<2x8x32xf32> to vector<16x32xf32>
    %c0_14 = arith.constant 0 : index
    %c0_15 = arith.constant 0 : index
    %35 = vector.load %arg3[%c0_14, %c0_15] : memref<16x32xf32, #tpu.memory_space<vmem>>, vector<16x32xf32>
    %cst_16 = arith.constant dense<0.000000e+00> : vector<16x16xf32>
    %36 = tpu.matmul %34, %35, %cst_16 {dimension_numbers = #tpu.dot_dimension_numbers<[1], [1], [0], [0], [0, 0, 1, 0], [], []>} : vector<16x32xf32>, vector<16x32xf32>, vector<16x16xf32> -> vector<16x16xf32>
    %37 = vector.shape_cast %36 : vector<16x16xf32> to vector<2x8x16xf32>
    %cst_17 = arith.constant dense<0.000000e+00> : vector<2x16xf32>
    %38 = vector.multi_reduction <add>, %37, %cst_17 [1] : vector<2x8x16xf32> to vector<2x16xf32>
    %39 = vector.shape_cast %38 : vector<2x16xf32> to vector<2x1x16xf32>
    %cst_18 = arith.constant 8.000000e+00 : f32
    %40 = vector.broadcast %cst_18 : f32 to vector<2x1x16xf32>
    %41 = arith.divf %39, %40 : vector<2x1x16xf32>
    %42 = vector.broadcast %41 : vector<2x1x16xf32> to vector<2x8x16xf32>
    %43 = arith.subf %37, %42 : vector<2x8x16xf32>
    %44 = arith.mulf %43, %43 : vector<2x8x16xf32>
    %cst_19 = arith.constant dense<0.000000e+00> : vector<2x16xf32>
    %45 = vector.multi_reduction <add>, %44, %cst_19 [1] : vector<2x8x16xf32> to vector<2x16xf32>
    %46 = vector.shape_cast %45 : vector<2x16xf32> to vector<2x1x16xf32>
    %cst_20 = arith.constant 8.000000e+00 : f32
    %47 = vector.broadcast %cst_20 : f32 to vector<2x1x16xf32>
    %48 = arith.divf %46, %47 : vector<2x1x16xf32>
    %c0_21 = arith.constant 0 : index
    %c0_22 = arith.constant 0 : index
    %49 = vector.load %arg5[%c0_21, %c0_22] : memref<2x16xf32, #tpu.memory_space<vmem>>, vector<1x16xf32>
    %cst_23 = arith.constant 9.99999974E-6 : f32
    %50 = vector.broadcast %cst_23 : f32 to vector<2x1x16xf32>
    %51 = arith.addf %48, %50 : vector<2x1x16xf32>
    %52 = math.rsqrt %51 : vector<2x1x16xf32>
    %53 = vector.shape_cast %49 : vector<1x16xf32> to vector<1x1x16xf32>
    %54 = vector.broadcast %53 : vector<1x1x16xf32> to vector<2x1x16xf32>
    %55 = arith.mulf %54, %52 : vector<2x1x16xf32>
    %56 = vector.broadcast %41 : vector<2x1x16xf32> to vector<2x8x16xf32>
    %57 = arith.subf %37, %56 : vector<2x8x16xf32>
    %58 = vector.broadcast %55 : vector<2x1x16xf32> to vector<2x8x16xf32>
    %59 = arith.mulf %57, %58 : vector<2x8x16xf32>
    %c1_24 = arith.constant 1 : index
    %c0_25 = arith.constant 0 : index
    %60 = vector.load %arg5[%c1_24, %c0_25] : memref<2x16xf32, #tpu.memory_space<vmem>>, vector<1x16xf32>
    %61 = vector.shape_cast %60 : vector<1x16xf32> to vector<1x1x16xf32>
    %62 = vector.broadcast %61 : vector<1x1x16xf32> to vector<2x8x16xf32>
    %63 = arith.addf %59, %62 : vector<2x8x16xf32>
    %64 = vector.extract_strided_slice %63 {offsets = [0, 0, 0], sizes = [1, 8, 16], strides = [1, 1, 1]} : vector<2x8x16xf32> to vector<1x8x16xf32>
    %65 = vector.shape_cast %64 : vector<1x8x16xf32> to vector<8x16xf32>
    %c0_26 = arith.constant 0 : index
    %c0_27 = arith.constant 0 : index
    %66 = vector.load %arg6[%c0_26, %c0_27] : memref<8x16xf32, #tpu.memory_space<vmem>>, vector<8x16xf32>
    tpu.vector_store %arg6[%c0_26, %c0_27], %65 {strides = array<i32>} : memref<8x16xf32, #tpu.memory_space<vmem>>, vector<8x16xf32>,
    %67 = vector.extract_strided_slice %63 {offsets = [1, 0, 0], sizes = [1, 8, 16], strides = [1, 1, 1]} : vector<2x8x16xf32> to vector<1x8x16xf32>
    %68 = vector.shape_cast %67 : vector<1x8x16xf32> to vector<8x16xf32>
    %c0_28 = arith.constant 0 : index
    %c0_29 = arith.constant 0 : index
    %69 = vector.load %arg7[%c0_28, %c0_29] : memref<8x16xf32, #tpu.memory_space<vmem>>, vector<8x16xf32>
    tpu.vector_store %arg7[%c0_28, %c0_29], %68 {strides = array<i32>} : memref<8x16xf32, #tpu.memory_space<vmem>>, vector<8x16xf32>,
    return
  }
}

</mosaic_0001>

<bundles_post_ra>
// kernel: tpu_custom_call.1
= control target key start
LH: loop header
LB: loop body
LE: loop exit
PB: predicated region body
PF: predicated region fallthrough
CT: control target
= control target key end

     0   :  { %13 = vsyncpa [#allocation3], 0  ;;  %s658_s0 = inlined_call_operand.hbm [shape: f32[8,32], index: 0, kind: input, shape index: {}]   ;;  %s659_s1 = inlined_call_operand.hbm [shape: f32[8,32], index: 1, kind: input, shape index: {}]   ;;  %s660_s2 = inlined_call_operand.hbm [shape: f32[32,32], index: 2, kind: input, shape index: {}]   ;;  %s661_s3 = inlined_call_operand.hbm [shape: f32[16,32], index: 3, kind: input, shape index: {}]   ;;  %s662_s4 = inlined_call_operand.vmem [shape: f32[2,32], index: 4, kind: input, shape index: {}]   ;;  %s663_s5 = inlined_call_operand.vmem [shape: f32[2,16], index: 5, kind: input, shape index: {}]   ;;  %s664_s6 = inlined_call_operand.hbm [shape: f32[8,16], index: 6, kind: output, shape index: {0}]   ;;  %s665_s7 = inlined_call_operand.hbm [shape: f32[8,16], index: 7, kind: output, shape index: {1}]  }
   0x1   :  { %14 = vsyncpa [#allocation6], 0 }
   0x2   :  { %15 = vsyncpa [#allocation9], 0 }
   0x3   :  { %16 = vsyncpa [#allocation4], 0  ;;  %s34_s26 = sshll.u32 %s659_s1, 4  ;;  %s35_s26 = int_to_ptr.hbm [resolvable:$true] %s34_s26 }
   0x4   :  { %17 = vsyncpa [#allocation12], 0  ;;  %s545_s27 = smov [#allocation5]   ;;  %s23_s8 = sshll.u32 %s658_s0, 4  ;;  %s24_s8 = int_to_ptr.hbm [resolvable:$true] %s23_s8 }
   0x5   :  { %s36_s28 = sshll.u32 %s545_s27, 4  ;;  %s546_s9 = smov [#allocation2]   ;;  %s37_s28 = int_to_ptr.vmem [resolvable:$true] %s36_s28 }
   0x6   :  { %39 = dma.hbm_to_vmem [thread:$0]  %s35_s26, 128, %s37_s28, [#allocation6]  }
   0x7   :  { %s25_s10 = sshll.u32 %s546_s9, 4  ;;  %s44_s13 = sshll.u32 %s660_s2, 4  ;;  %s26_s10 = int_to_ptr.vmem [resolvable:$true] %s25_s10  ;;  %s45_s13 = int_to_ptr.hbm [resolvable:$true] %s44_s13 }
   0x8   :  { %28 = dma.hbm_to_vmem [thread:$0]  %s24_s8, 128, %s26_s10, [#allocation3]  }
   0x9   :  { %s547_s1 = smov [#allocation7]   ;;  %s57_s17 = sshll.u32 %s661_s3, 4  ;;  %s58_s17 = int_to_ptr.hbm [resolvable:$true] %s57_s17 }
   0xa   :  { %s46_s14 = sshll.u32 %s547_s1, 4  ;;  %s548_s18 = smov 128   ;;  %s47_s14 = int_to_ptr.vmem [resolvable:$true] %s46_s14 }
   0xb   :  { %s549_s0 = smov 8   ;;  %s550_s19 = smov [#allocation8]  }
   0xc   :  { %52 = dma.hbm_to_vmem [thread:$0]  %s45_s13, 512, %s47_s14, [#allocation6], %s548_s18, %s548_s18, %s549_s0  }
   0xd   :  { %s59_s20 = sshll.u32 %s550_s19, 4  ;;  %s60_s20 = int_to_ptr.vmem [resolvable:$true] %s59_s20 }
   0xe   :  { %65 = dma.hbm_to_vmem [thread:$0]  %s58_s17, 256, %s60_s20, [#allocation9], %s548_s18, %s548_s18, %s549_s0  }
   0xf   :  { %535 = dma.done.wait [#allocation3], 128  }
  0x10   :  { %536 = vsyncadd [#allocation3], 4294967168 }
  0x11   :  { %537 = dma.done.wait [#allocation6], 640  }
  0x12   :  { %538 = vsyncadd [#allocation6], 4294966656 }
  0x13   :  { %539 = dma.done.wait [#allocation9], 256  }
  0x14   :  { %540 = vsyncadd [#allocation9], 4294967040  ;;  %vm92_vm0 = vcmask 261120   ;;  %v91_v0 = vld [vmem:[#allocation7 + $0x18] sm:$0xff]  ;;  %v90_v1 = vld [vmem:[#allocation7 + $0x10] sm:$0xff]  ;;  %v551_v6 = vmov 8.0  }
  0x15   :  { %356 = vmatpush.xpose.msk.msra.mxu0 %vm92_vm0, %v91_v0  ;;  %366 = vmatpush.xpose.msk.msra.mxu2 %vm92_vm0, %v91_v0  ;;  %v89_v2 = vld [vmem:[#allocation7 + $0x8] sm:$0xff]  ;;  %v88_v3 = vld [vmem:[#allocation7] sm:$0xff]  ;;  %v86_v4 = vld [vmem:[#allocation2] sm:$0xff]  ;;  %381 = vrcp.f32 %v551_v6  ;;  %vm249_vm8 = vcmask 130048   ;;  %s552_s26 = smov [#allocation10]   ;;  %s328_s30 = sshll.u32 %s664_s6, 4  ;;  %s329_s30 = int_to_ptr.hbm [resolvable:$true] %s328_s30 }
  0x16   :  { %v87_v5 = vld [vmem:[#allocation5] sm:$0xff]  ;;  %v213_v39 = vld [vmem:[#allocation8 + $0x8] sm:$0xff]  ;;  %v212_v45 = vld [vmem:[#allocation8] sm:$0xff]  ;;  %s326_s27 = sshll.u32 %s552_s26, 4  ;;  %s339_s11 = sshll.u32 %s665_s7, 4  ;;  %s327_s27 = int_to_ptr.vmem [resolvable:$true] %s326_s27  ;;  %s340_s11 = int_to_ptr.hbm [resolvable:$true] %s339_s11 }
  0x17   :  { %362 = vmatpush.xpose.msk.msra.mxu1 %vm92_vm0, %v213_v39  ;;  %v177_v62 = vld [vmem:[%s662_s4] sm:$0x1]  ;;  %v379_v6 = vld [vmem:[%s662_s4 + $0x1] ss:$0 sm:$0xff] }
  0x19   :  { %357 = vmatpush.xpose.msk.msra.mxu0 %vm92_vm0, %v90_v1  ;;  %367 = vmatpush.xpose.msk.msra.mxu2 %vm92_vm0, %v90_v1 }
  0x1b   :  { %v382_v7 = vpop.eup %381  ;;  %363 = vmatpush.xpose.msk.msra.mxu1 %vm92_vm0, %v212_v45 }
  0x1c   :  { %v149_v8 = vmul.f32 8.0, %v382_v7  ;;  %vm153_vm1 = vweird.f32 %v382_v7 }
  0x1d   :  { %358 = vmatpush.xpose.msk.msra.mxu0 %vm92_vm0, %v89_v2  ;;  %368 = vmatpush.xpose.msk.msra.mxu2 %vm92_vm0, %v89_v2 }
  0x1e   :  { %v150_v9 = vsub.f32 1.0, %v149_v8 }
  0x20   :  { %v151_v13 = vmul.f32 %v382_v7, %v150_v9 }
  0x21   :  { %359 = vmatpush.xpose.msk.msra.mxu0 %vm92_vm0, %v88_v3  ;;  %369 = vmatpush.xpose.msk.msra.mxu2 %vm92_vm0, %v88_v3 }
  0x22   :  { %v152_v17 = vadd.f32 %v382_v7, %v151_v13 }
  0x24   :  { %360 = vmatmul.msk.f32.vlgmr.msra.gmra.mxu0 %vm92_vm0, %v86_v4  ;;  %361 = vmatmul.msk.f32.vlgmr.msra.gmra.mxu2 %vm92_vm0, %v87_v5  ;;  %v618_v23 = vsel %vm153_vm1, %v382_v7, %v152_v17 }
  0xa1   :  { %v128_v10 = vpop.f32.mrf.mxu0 }
  0xa2   :  { %v134_v11 = vsel %vm92_vm0, %v128_v10, 0.0 }
  0xa3   :  { %v135_v12 = vrot.slane %v134_v11, 4 }
  0xa5   :  { %v136_v14 = vadd.f32 %v135_v12, %v134_v11 }
  0xa7   :  { %v137_v15 = vrot.slane %v136_v14, 2  ;;  %v131_v16 = vpop.f32.mrf.mxu2 }
  0xa8   :  { %v141_v18 = vsel %vm92_vm0, %v131_v16, 0.0 }
  0xa9   :  { %v138_v19 = vadd.f32 %v137_v15, %v136_v14  ;;  %v142_v20 = vrot.slane %v141_v18, 4 }
  0xab   :  { %v139_v21 = vrot.slane %v138_v19, 1  ;;  %v143_v22 = vadd.f32 %v142_v20, %v141_v18 }
  0xad   :  { %v140_v24 = vadd.f32 %v139_v21, %v138_v19  ;;  %v144_v25 = vrot.slane %v143_v22, 2 }
  0xaf   :  { %v155_v26 = vmul.f32 %v618_v23, %v140_v24  ;;  %v145_v27 = vadd.f32 %v144_v25, %v143_v22 }
  0xb1   :  { %v157_v28 = vsub.f32 %v128_v10, %v155_v26  ;;  %v146_v29 = vrot.slane %v145_v27, 1 }
  0xb3   :  { %v159_v30 = vmul.f32 %v157_v28, %v157_v28  ;;  %v147_v31 = vadd.f32 %v146_v29, %v145_v27 }
  0xb5   :  { %v161_v32 = vsel %vm92_vm0, %v159_v30, 0.0  ;;  %v156_v33 = vmul.f32 %v618_v23, %v147_v31 }
  0xb6   :  { %v162_v34 = vrot.slane %v161_v32, 4 }
  0xb7   :  { %v158_v35 = vsub.f32 %v131_v16, %v156_v33 }
  0xb8   :  { %v163_v36 = vadd.f32 %v162_v34, %v161_v32 }
  0xb9   :  { %v160_v37 = vmul.f32 %v158_v35, %v158_v35 }
  0xba   :  { %v164_v38 = vrot.slane %v163_v36, 2 }
  0xbb   :  { %v168_v40 = vsel %vm92_vm0, %v160_v37, 0.0 }
  0xbc   :  { %v165_v41 = vadd.f32 %v164_v38, %v163_v36  ;;  %v169_v42 = vrot.slane %v168_v40, 4 }
  0xbe   :  { %v166_v43 = vrot.slane %v165_v41, 1  ;;  %v170_v44 = vadd.f32 %v169_v42, %v168_v40 }
  0xc0   :  { %v167_v46 = vadd.f32 %v166_v43, %v165_v41  ;;  %v171_v47 = vrot.slane %v170_v44, 2 }
  0xc2   :  { %v175_v48 = vmul.f32 %v167_v46, %v618_v23  ;;  %v172_v49 = vadd.f32 %v171_v47, %v170_v44 }
  0xc4   :  { %v178_v50 = vadd.f32 1e-05, %v175_v48  ;;  %v173_v51 = vrot.slane %v172_v49, 1 }
  0xc6   :  { %383 = vrsqrt.f32 %v178_v50  ;;  %v174_v52 = vadd.f32 %v173_v51, %v172_v49  ;;  %vm186_vm3 = vweird.f32 %v178_v50 }
  0xc8   :  { %v176_v53 = vmul.f32 %v174_v52, %v618_v23 }
  0xca   :  { %v179_v54 = vadd.f32 1e-05, %v176_v53 }
  0xcc   :  { %v384_v55 = vpop.eup %383  ;;  %385 = vrsqrt.f32 %v179_v54  ;;  %vm196_vm6 = vweird.f32 %v179_v54 }
  0xcd   :  { %v181_v56 = vmul.f32 %v384_v55, %v178_v50  ;;  %vm187_vm2 = vweird.f32 %v384_v55 }
  0xce   :  { %vm188_vm4 = vmor %vm186_vm3, %vm187_vm2 }
  0xcf   :  { %v182_v57 = vmul.f32 %v384_v55, %v181_v56 }
  0xd1   :  { %v183_v58 = vmul.f32 0.5, %v182_v57 }
  0xd2   :  { %v386_v59 = vpop.eup %385 }
  0xd3   :  { %v184_v60 = vsub.f32 1.5, %v183_v58  ;;  %v191_v61 = vmul.f32 %v386_v59, %v179_v54  ;;  %vm197_vm5 = vweird.f32 %v386_v59 }
  0xd4   :  { %vm198_vm7 = vmor %vm196_vm6, %vm197_vm5 }
  0xd5   :  { %v185_v63 = vmul.f32 %v384_v55, %v184_v60  ;;  %v192_v0 = vmul.f32 %v386_v59, %v191_v61 }
  0xd7   :  { %v189_v1 = vsel %vm188_vm4, %v384_v55, %v185_v63  ;;  %v193_v2 = vmul.f32 0.5, %v192_v0  ;;  %v286_v0 = vld [vmem:[%s663_s5] sm:$0x1] }
  0xd8   :  { %v200_v3 = vmul.f32 %v189_v1, %v177_v62 }
  0xd9   :  { %v194_v4 = vsub.f32 1.5, %v193_v2 }
  0xda   :  { %v202_v5 = vperm.slane %v200_v3, 0 }
  0xdb   :  { %v195_v7 = vmul.f32 %v386_v59, %v194_v4 }
  0xdc   :  { %v204_v8 = vmul.f32 %v202_v5, %v157_v28 }
  0xdd   :  { %v199_v9 = vsel %vm198_vm7, %v386_v59, %v195_v7  ;;  %v380_v7 = vld [vmem:[%s663_s5 + $0x1] ss:$0 sm:$0xff]  ;;  %s553_s5 = smov [#allocation11]  }
  0xde   :  { %v201_v10 = vmul.f32 %v199_v9, %v177_v62  ;;  %v208_v11 = vadd.f32 %v379_v6, %v204_v8  ;;  %s337_s8 = sshll.u32 %s553_s5, 4  ;;  %s338_s8 = int_to_ptr.vmem [resolvable:$true] %s337_s8 }
  0xe0   :  { %v203_v12 = vperm.slane %v201_v10, 0  ;;  %v210_v13 = vmax.f32 %v208_v11, 0.0 }
  0xe2   :  { %v205_v14 = vmul.f32 %v203_v12, %v158_v35  ;;  %364 = vmatmul.msk.f32.vlgmr.msra.gmra.mxu1 %vm92_vm0, %v210_v13 }
  0xe4   :  { %v209_v15 = vadd.f32 %v379_v6, %v205_v14 }
  0xe6   :  { %v211_v16 = vmax.f32 %v209_v15, 0.0 }
  0xea   :  { %365 = vmatmul.msk.f32.gmra.mxu1 %vm92_vm0, %v211_v16 }
 0x15f   :  { %v243_v17 = vpop.f32.mrf.mxu1 }
 0x160   :  { %v250_v18 = vsel %vm249_vm8, %v243_v17, 0.0 }
 0x161   :  { %v251_v19 = vrot.slane %v250_v18, 4 }
 0x163   :  { %v252_v20 = vadd.f32 %v251_v19, %v250_v18 }
 0x165   :  { %v253_v21 = vrot.slane %v252_v20, 2 }
 0x167   :  { %v254_v22 = vadd.f32 %v253_v21, %v252_v20  ;;  %v246_v24 = vpop.f32.mrf.mxu1 }
 0x168   :  { %v257_v25 = vsel %vm249_vm8, %v246_v24, 0.0 }
 0x169   :  { %v255_v26 = vrot.slane %v254_v22, 1  ;;  %v258_v27 = vrot.slane %v257_v25, 4 }
 0x16b   :  { %v256_v28 = vadd.f32 %v255_v26, %v254_v22  ;;  %v259_v29 = vadd.f32 %v258_v27, %v257_v25 }
 0x16d   :  { %v264_v30 = vmul.f32 %v256_v28, %v618_v23  ;;  %v260_v31 = vrot.slane %v259_v29, 2 }
 0x16f   :  { %v266_v32 = vsub.f32 %v243_v17, %v264_v30  ;;  %v261_v33 = vadd.f32 %v260_v31, %v259_v29 }
 0x171   :  { %v268_v34 = vmul.f32 %v266_v32, %v266_v32  ;;  %v262_v35 = vrot.slane %v261_v33, 1 }
 0x173   :  { %v270_v36 = vsel %vm249_vm8, %v268_v34, 0.0  ;;  %v263_v37 = vadd.f32 %v262_v35, %v261_v33 }
 0x174   :  { %v271_v38 = vrot.slane %v270_v36, 4 }
 0x175   :  { %v265_v39 = vmul.f32 %v263_v37, %v618_v23 }
 0x176   :  { %v272_v40 = vadd.f32 %v271_v38, %v270_v36 }
 0x177   :  { %v267_v41 = vsub.f32 %v246_v24, %v265_v39 }
 0x178   :  { %v273_v42 = vrot.slane %v272_v40, 2 }
 0x179   :  { %v269_v43 = vmul.f32 %v267_v41, %v267_v41 }
 0x17a   :  { %v274_v44 = vadd.f32 %v273_v42, %v272_v40 }
 0x17b   :  { %v277_v45 = vsel %vm249_vm8, %v269_v43, 0.0 }
 0x17c   :  { %v275_v46 = vrot.slane %v274_v44, 1  ;;  %v278_v47 = vrot.slane %v277_v45, 4 }
 0x17e   :  { %v276_v48 = vadd.f32 %v275_v46, %v274_v44  ;;  %v279_v49 = vadd.f32 %v278_v47, %v277_v45 }
 0x180   :  { %v284_v50 = vmul.f32 %v276_v48, %v618_v23  ;;  %v280_v51 = vrot.slane %v279_v49, 2 }
 0x182   :  { %v287_v52 = vadd.f32 1e-05, %v284_v50  ;;  %v281_v53 = vadd.f32 %v280_v51, %v279_v49 }
 0x184   :  { %387 = vrsqrt.f32 %v287_v52  ;;  %v282_v54 = vrot.slane %v281_v53, 1  ;;  %vm295_vm10 = vweird.f32 %v287_v52 }
 0x186   :  { %v283_v55 = vadd.f32 %v282_v54, %v281_v53 }
 0x188   :  { %v285_v56 = vmul.f32 %v283_v55, %v618_v23 }
 0x18a   :  { %v388_v57 = vpop.eup %387  ;;  %v288_v58 = vadd.f32 1e-05, %v285_v56 }
 0x18b   :  { %v290_v59 = vmul.f32 %v388_v57, %v287_v52  ;;  %vm296_vm9 = vweird.f32 %v388_v57 }
 0x18c   :  { %389 = vrsqrt.f32 %v288_v58  ;;  %vm297_vm11 = vmor %vm295_vm10, %vm296_vm9  ;;  %vm305_vm13 = vweird.f32 %v288_v58 }
 0x18d   :  { %v291_v60 = vmul.f32 %v388_v57, %v290_v59 }
 0x18f   :  { %v292_v61 = vmul.f32 0.5, %v291_v60 }
 0x191   :  { %v293_v62 = vsub.f32 1.5, %v292_v61 }
 0x192   :  { %v390_v63 = vpop.eup %389 }
 0x193   :  { %v294_v1 = vmul.f32 %v388_v57, %v293_v62  ;;  %v300_v2 = vmul.f32 %v390_v63, %v288_v58  ;;  %vm306_vm12 = vweird.f32 %v390_v63 }
 0x194   :  { %vm307_vm14 = vmor %vm305_vm13, %vm306_vm12 }
 0x195   :  { %v298_v3 = vsel %vm297_vm11, %v388_v57, %v294_v1  ;;  %v301_v4 = vmul.f32 %v390_v63, %v300_v2 }
 0x196   :  { %v309_v23 = vmul.f32 %v298_v3, %v286_v0 }
 0x197   :  { %v302_v5 = vmul.f32 0.5, %v301_v4 }
 0x198   :  { %v311_v6 = vperm.slane %v309_v23, 0 }
 0x199   :  { %v303_v8 = vsub.f32 1.5, %v302_v5 }
 0x19a   :  { %v313_v9 = vmul.f32 %v311_v6, %v266_v32 }
 0x19b   :  { %v304_v10 = vmul.f32 %v390_v63, %v303_v8 }
 0x19c   :  { %v317_v11 = vadd.f32 %v380_v7, %v313_v9 }
 0x19d   :  { %v308_v12 = vsel %vm307_vm14, %v390_v63, %v304_v10 }
 0x19e   :  { %319 = vst.msk [vmem:[#allocation10] sm:$0xff] %vm249_vm8, %v317_v11  ;;  %v310_v13 = vmul.f32 %v308_v12, %v286_v0 }
 0x19f   :  { %331 = dma.vmem_to_hbm [thread:$0]  %s327_s27, 128, %s329_s30, [#allocation4]  }
 0x1a0   :  { %v312_v14 = vperm.slane %v310_v13, 0 }
 0x1a2   :  { %v314_v15 = vmul.f32 %v312_v14, %v267_v41 }
 0x1a4   :  { %v318_v16 = vadd.f32 %v380_v7, %v314_v15 }
 0x1a6   :  { %320 = vst.msk [vmem:[#allocation11] sm:$0xff] %vm249_vm8, %v318_v16 }
 0x1a7   :  { %342 = dma.vmem_to_hbm [thread:$0]  %s338_s8, 128, %s340_s11, [#allocation12]  }
 0x1a8   :  { %541 = dma.done.wait [#allocation4], 128  }
 0x1a9   :  { %542 = vsyncadd [#allocation4], 4294967168 }
 0x1aa   :  { %543 = dma.done.wait [#allocation12], 128  }
 0x1ab   :  { %544 = vsyncadd [#allocation12], 4294967168 }
 0x1ac   :  { %351 = vsyncpa [#allocation3], 1 }
 0x1ad   :  { %352 = vsyncpa [#allocation6], 1 }
 0x1ae   :  { %353 = vsyncpa [#allocation9], 1 }
 0x1af   :  { %354 = vsyncpa [#allocation4], 1 }
 0x1b0   :  { %355 = vsyncpa [#allocation12], 1 }

</bundles_post_ra>
